<compile_context>
chip_gen: v6e
topology: v6e:2x2x1
jax: 0.10.0
libtpu: 0.0.40
codegen_flags: <defaults>
</compile_context>

<pallas_src>
import jax
import jax.numpy as jnp
from jax.experimental import pallas as pl
from jax.experimental.pallas import tpu as pltpu

_LANES = 128
_SUBLANES = 8
_TILE_ROWS_MAX = 2048          # 2048 x 128 f32 = 1 MiB per input tile
_NUM_CORES = 2                 # leading "parallel" axis (dual-TC on v7x)


def _round_up(x, m):
    return -(-x // m) * m


def _make_kernel(tile_rows, tiles_per_core, valid_rows, needs_mask):
    sub = tile_rows // _SUBLANES   # tile_rows is a multiple of 32 -> exact

    def kernel(recons_ref, input_ref, mu_ref, logvar_ref, sse_ref, kld_ref, acc_ref):
        step = pl.program_id(1)

        @pl.when(step == 0)
        def _init():
            acc_ref[...] = jnp.zeros_like(acc_ref)

        d = recons_ref[...].astype(jnp.float32) - input_ref[...].astype(jnp.float32)

        if needs_mask:
            # Nominal (unclamped) tile index -> global row offset of this block.
            # Masks (a) the ragged last row-tile and (b) fully-out-of-range
            # dummy tiles from the per-core split (whose DMA index was clamped
            # in the index_map, so the loaded data is a harmless re-read).
            tile_idx = pl.program_id(0) * tiles_per_core + step
            row_off = tile_idx * tile_rows
            row_idx = jax.lax.broadcasted_iota(jnp.int32, (tile_rows, _LANES), 0)
            d = jnp.where(row_idx < (valid_rows - row_off), d, 0.0)

        # Keep the running partial at vreg shape (8, 128): the per-step
        # reduction is pure VALU adds (no per-step XLU cross-sublane reduce).
        acc_ref[...] += jnp.sum((d * d).reshape(sub, _SUBLANES, _LANES), axis=0)

        @pl.when(step == tiles_per_core - 1)
        def _finalize():
            # Per-core SSE partial, still lane/sublane-kept; collapsed in JAX.
            sse_ref[0] = acc_ref[...]
            # KL term is tiny: compute it once per core at the last step.
            mu = mu_ref[...].astype(jnp.float32)
            lv = logvar_ref[...].astype(jnp.float32)
            kld_per = -0.5 * jnp.sum(1.0 + lv - mu * mu - jnp.exp(lv),
                                     axis=1, keepdims=True)          # (N, 1)
            kld_ref[0] = jnp.mean(kld_per, axis=0, keepdims=True)     # (1, 1)

    return kernel


def beta_vae_loss(recons, inp, mu, log_var, *, num_iter,
                  beta=4.0, gamma=1000.0, kld_weight=0.00025,
                  max_capacity=25.0, capacity_max_iter=1e5, loss_type='B'):
    assert recons.shape == inp.shape, "recons and input must match"
    assert mu.shape == log_var.shape and mu.ndim == 2, "mu/log_var must be [N, D]"

    total_elems = recons.size
    rf = recons.reshape(-1)
    xf = inp.reshape(-1)

    # Lane-dense [rows, 128] view of the flattened inputs.
    rows = pl.cdiv(total_elems, _LANES)
    if rows < _TILE_ROWS_MAX:
        # Small inputs: a single 32-aligned row tile (block == full array).
        rows = _round_up(max(rows, 1), 32)
        tile_rows = rows
    else:
        tile_rows = _TILE_ROWS_MAX

    pad = rows * _LANES - total_elems
    if pad:
        # Zero-pad both operands identically -> contributes 0 to the SSE.
        # TODO(synk): only hit for tiny arrays or a sub-128 lane remainder;
        # this jnp.pad copies both inputs once in that rare case.
        rf = jnp.pad(rf, (0, pad))
        xf = jnp.pad(xf, (0, pad))
    r2 = rf.reshape(rows, _LANES)
    x2 = xf.reshape(rows, _LANES)

    num_row_tiles = pl.cdiv(rows, tile_rows)
    tiles_per_core = pl.cdiv(num_row_tiles, _NUM_CORES)
    needs_mask = (num_row_tiles * tile_rows != rows) or (num_row_tiles % _NUM_CORES != 0)

    n, d = mu.shape

    def _row_map(c, i):
        # Clamp so the DMA never indexes past the array; out-of-range tiles are
        # re-reads of the last tile and get zeroed by the in-kernel row mask.
        return (jnp.minimum(c * tiles_per_core + i, num_row_tiles - 1), 0)

    kernel = _make_kernel(tile_rows, tiles_per_core, rows, needs_mask)

    sse_parts, kld_parts = pl.pallas_call(
        kernel,
        out_shape=(jax.ShapeDtypeStruct((_NUM_CORES, _SUBLANES, _LANES), jnp.float32),
                   jax.ShapeDtypeStruct((_NUM_CORES, 1, 1), jnp.float32)),
        grid_spec=pltpu.PrefetchScalarGridSpec(
            num_scalar_prefetch=0,
            grid=(_NUM_CORES, tiles_per_core),
            in_specs=[
                pl.BlockSpec((tile_rows, _LANES), _row_map),
                pl.BlockSpec((tile_rows, _LANES), _row_map),
                pl.BlockSpec((n, d), lambda c, i: (0, 0)),   # resident, tiny
                pl.BlockSpec((n, d), lambda c, i: (0, 0)),
            ],
            out_specs=(pl.BlockSpec((1, _SUBLANES, _LANES), lambda c, i: (c, 0, 0)),
                       pl.BlockSpec((1, 1, 1), lambda c, i: (c, 0, 0))),
            scratch_shapes=[pltpu.VMEM((_SUBLANES, _LANES), jnp.float32)],
        ),
        compiler_params=pltpu.CompilerParams(
            dimension_semantics=("parallel", "arbitrary"),
        ),
    )(r2, x2, mu, log_var)

    # Tiny epilogue in plain JAX: collapse per-core partials + scalar schedule.
    recons_loss = jnp.sum(sse_parts) / jnp.float32(total_elems)
    kld_loss = kld_parts[0, 0, 0]

    num_iter = jnp.asarray(num_iter, dtype=jnp.float32)   # traced -> no retrace
    if loss_type == 'H':
        loss = recons_loss + beta * kld_weight * kld_loss
    elif loss_type == 'B':
        C = jnp.clip(jnp.float32(max_capacity) / jnp.float32(capacity_max_iter) * num_iter,
                     0.0, jnp.float32(max_capacity))
        loss = recons_loss + gamma * kld_weight * jnp.abs(kld_loss - C)
    else:
        raise ValueError('Undefined loss type.')

    return {'loss': loss, 'recons_loss': recons_loss, 'kld_loss': kld_loss}


def _bce_with_logits(logits, targets):
    """Numerically-stable mean BCE-with-logits (matches nn.BCEWithLogitsLoss)."""
    x = logits.astype(jnp.float32)
    y = targets.astype(jnp.float32)
    return jnp.mean(jnp.maximum(x, 0.0) - x * y + jnp.log1p(jnp.exp(-jnp.abs(x))))


class BetaVAELoss:
    """Stateful wrapper mirroring the PyTorch module's num_iter counter."""

    def __init__(self, beta=4, gamma=1000, kld_weight=0.00025, max_capacity=25,
                 capacity_max_iter=1e5, loss_type='B'):
        self.num_iter = 0
        self.beta = float(beta)
        self.gamma = float(gamma)
        self.kld_weight = float(kld_weight)
        self.max_capacity = float(max_capacity)
        self.capacity_max_iter = float(capacity_max_iter)
        self.loss_type = loss_type

    def __call__(self, model_out, head_true=None):
        self.num_iter += 1
        recons, inp, mu, log_var = model_out[0], model_out[1], model_out[2], model_out[3]
        out = beta_vae_loss(recons, inp, mu, log_var,
                            num_iter=jnp.asarray(self.num_iter, jnp.float32),
                            beta=self.beta, gamma=self.gamma,
                            kld_weight=self.kld_weight,
                            max_capacity=self.max_capacity,
                            capacity_max_iter=self.capacity_max_iter,
                            loss_type=self.loss_type)
        if len(model_out) == 5 and head_true is not None:
            # Optional classifier-head branch (plain JAX; head is tiny).
            classifier_loss = _bce_with_logits(model_out[4], head_true)
            out['classifier_loss'] = classifier_loss
            out['loss'] = out['loss'] + classifier_loss
        return out


if __name__ == "__main__":
    key = jax.random.PRNGKey(0)
    k1, k2, k3, k4 = jax.random.split(key, 4)

    # Model-output tuple consistent with a Beta-VAE forward:
    # recons/input: [N=2, C=4, H=16, W=16]; mu/log_var: [N=2, D=32]
    recons = jax.random.normal(k1, (2, 4, 16, 16), dtype=jnp.float32)
    inp = jax.random.normal(k2, (2, 4, 16, 16), dtype=jnp.float32)
    mu = 0.5 * jax.random.normal(k3, (2, 32), dtype=jnp.float32)
    log_var = 0.5 * jax.random.normal(k4, (2, 32), dtype=jnp.float32)

    loss_fn = BetaVAELoss()
    out = loss_fn((recons, inp, mu, log_var))
    out = jax.tree_util.tree_map(jax.block_until_ready, out)

    # Pure-JAX reference (mirrors the PyTorch forward, loss_type='B', num_iter=1).
    recons_loss_ref = jnp.mean((recons - inp) ** 2)
    kld_ref = jnp.mean(
        -0.5 * jnp.sum(1.0 + log_var - mu ** 2 - jnp.exp(log_var), axis=1), axis=0)
    C_ref = jnp.clip(25.0 / 1e5 * 1, 0.0, 25.0)
    loss_ref = recons_loss_ref + 1000.0 * 0.00025 * jnp.abs(kld_ref - C_ref)

    assert jnp.allclose(out['recons_loss'], recons_loss_ref, rtol=1e-5, atol=1e-5)
    assert jnp.allclose(out['kld_loss'], kld_ref, rtol=1e-5, atol=1e-5)
    assert jnp.allclose(out['loss'], loss_ref, rtol=1e-5, atol=1e-5)

    print("KERNEL_OK")
</pallas_src>

<mosaic_0001>
module attributes {stable_mosaic.version = 11 : i64} {
  func.func @kernel(%arg0: i32, %arg1: i32, %arg2: memref<32x128xf32, #tpu.memory_space<vmem>>, %arg3: memref<32x128xf32, #tpu.memory_space<vmem>>, %arg4: memref<2x32xf32, #tpu.memory_space<vmem>>, %arg5: memref<2x32xf32, #tpu.memory_space<vmem>>, %arg6: memref<1x8x128xf32, #tpu.memory_space<vmem>>, %arg7: memref<1x1x1xf32, #tpu.memory_space<vmem>>, %arg8: memref<8x128xf32, #tpu.memory_space<vmem>>) attributes {dimension_semantics = [#tpu.dimension_semantics<parallel>, #tpu.dimension_semantics<arbitrary>], iteration_bounds = array<i64: 2, 1>, scalar_prefetch = 0 : i64, scratch_operands = 1 : i64, tpu.core_type = #tpu.core_type<tc>, window_params = [{transform_indices = @transform_0, window_bounds = array<i64: 32, 128>}, {transform_indices = @transform_1, window_bounds = array<i64: 32, 128>}, {pipeline_mode = #tpu.pipeline_mode<synchronous>, transform_indices = @transform_2, window_bounds = array<i64: 2, 32>}, {pipeline_mode = #tpu.pipeline_mode<synchronous>, transform_indices = @transform_3, window_bounds = array<i64: 2, 32>}, {transform_indices = @transform_4, window_bounds = array<i64: 1, 8, 128>}, {transform_indices = @transform_5, window_bounds = array<i64: 1, 1, 1>}]} {
    %c0_i32 = arith.constant 0 : i32
    %0 = arith.cmpi eq, %arg1, %c0_i32 : i32
    %1 = arith.extui %0 : i1 to i32
    %c0_i32_0 = arith.constant 0 : i32
    %2 = arith.cmpi ne, %1, %c0_i32_0 : i32
    scf.if %2 {
      %cst_12 = arith.constant 0.000000e+00 : f32
      %24 = vector.broadcast %cst_12 : f32 to vector<8x128xf32>
      %c0_13 = arith.constant 0 : index
      %c0_14 = arith.constant 0 : index
      %25 = vector.load %arg8[%c0_13, %c0_14] : memref<8x128xf32, #tpu.memory_space<vmem>>, vector<8x128xf32>
      tpu.vector_store %arg8[%c0_13, %c0_14], %24 {strides = array<i32>} : memref<8x128xf32, #tpu.memory_space<vmem>>, vector<8x128xf32>,
    } else {
    }
    %c0 = arith.constant 0 : index
    %c0_1 = arith.constant 0 : index
    %3 = vector.load %arg2[%c0, %c0_1] : memref<32x128xf32, #tpu.memory_space<vmem>>, vector<32x128xf32>
    %c0_2 = arith.constant 0 : index
    %c0_3 = arith.constant 0 : index
    %4 = vector.load %arg3[%c0_2, %c0_3] : memref<32x128xf32, #tpu.memory_space<vmem>>, vector<32x128xf32>
    %5 = arith.subf %3, %4 : vector<32x128xf32>
    %c1_i32 = arith.constant 1 : i32
    %6 = arith.muli %arg0, %c1_i32 : i32
    %7 = arith.addi %6, %arg1 : i32
    %c32_i32 = arith.constant 32 : i32
    %8 = arith.muli %7, %c32_i32 : i32
    %9 = tpu.iota {dimensions = array<i32: 0>} : vector<32x128xi32>
    %c32_i32_4 = arith.constant 32 : i32
    %10 = arith.subi %c32_i32_4, %8 : i32
    %11 = vector.broadcast %10 : i32 to vector<32x128xi32>
    %12 = arith.cmpi slt, %9, %11 : vector<32x128xi32>
    %cst = arith.constant 0.000000e+00 : f32
    %13 = vector.broadcast %cst : f32 to vector<32x128xf32>
    %14 = arith.select %12, %5, %13 : vector<32x128xi1>, vector<32x128xf32>
    %c0_5 = arith.constant 0 : index
    %c0_6 = arith.constant 0 : index
    %15 = vector.load %arg8[%c0_5, %c0_6] : memref<8x128xf32, #tpu.memory_space<vmem>>, vector<8x128xf32>
    %16 = arith.mulf %14, %14 : vector<32x128xf32>
    %17 = vector.shape_cast %16 : vector<32x128xf32> to vector<4x8x128xf32>
    %cst_7 = arith.constant dense<0.000000e+00> : vector<8x128xf32>
    %18 = vector.multi_reduction <add>, %17, %cst_7 [0] : vector<4x8x128xf32> to vector<8x128xf32>
    %19 = arith.addf %15, %18 : vector<8x128xf32>
    %c0_8 = arith.constant 0 : index
    %c0_9 = arith.constant 0 : index
    %20 = vector.load %arg8[%c0_8, %c0_9] : memref<8x128xf32, #tpu.memory_space<vmem>>, vector<8x128xf32>
    tpu.vector_store %arg8[%c0_8, %c0_9], %19 {strides = array<i32>} : memref<8x128xf32, #tpu.memory_space<vmem>>, vector<8x128xf32>,
    %c0_i32_10 = arith.constant 0 : i32
    %21 = arith.cmpi eq, %arg1, %c0_i32_10 : i32
    %22 = arith.extui %21 : i1 to i32
    %c0_i32_11 = arith.constant 0 : i32
    %23 = arith.cmpi ne, %22, %c0_i32_11 : i32
    scf.if %23 {
      %c0_12 = arith.constant 0 : index
      %c0_13 = arith.constant 0 : index
      %24 = vector.load %arg8[%c0_12, %c0_13] : memref<8x128xf32, #tpu.memory_space<vmem>>, vector<8x128xf32>
      %c0_14 = arith.constant 0 : index
      %c0_15 = arith.constant 0 : index
      %c0_16 = arith.constant 0 : index
      %25 = vector.load %arg6[%c0_14, %c0_15, %c0_16] : memref<1x8x128xf32, #tpu.memory_space<vmem>>, vector<1x8x128xf32>
      %26 = vector.shape_cast %25 : vector<1x8x128xf32> to vector<8x128xf32>
      %27 = vector.shape_cast %24 : vector<8x128xf32> to vector<1x8x128xf32>
      tpu.vector_store %arg6[%c0_14, %c0_15, %c0_16], %27 {strides = array<i32>} : memref<1x8x128xf32, #tpu.memory_space<vmem>>, vector<1x8x128xf32>,
      %c0_17 = arith.constant 0 : index
      %c0_18 = arith.constant 0 : index
      %28 = vector.load %arg4[%c0_17, %c0_18] : memref<2x32xf32, #tpu.memory_space<vmem>>, vector<2x32xf32>
      %c0_19 = arith.constant 0 : index
      %c0_20 = arith.constant 0 : index
      %29 = vector.load %arg5[%c0_19, %c0_20] : memref<2x32xf32, #tpu.memory_space<vmem>>, vector<2x32xf32>
      %cst_21 = arith.constant 1.000000e+00 : f32
      %30 = vector.broadcast %cst_21 : f32 to vector<2x32xf32>
      %31 = arith.addf %30, %29 : vector<2x32xf32>
      %32 = arith.mulf %28, %28 : vector<2x32xf32>
      %33 = arith.subf %31, %32 : vector<2x32xf32>
      %34 = math.exp %29 : vector<2x32xf32>
      %35 = arith.subf %33, %34 : vector<2x32xf32>
      %cst_22 = arith.constant dense<0.000000e+00> : vector<2xf32>
      %36 = vector.multi_reduction <add>, %35, %cst_22 [1] : vector<2x32xf32> to vector<2xf32>
      %37 = vector.shape_cast %36 : vector<2xf32> to vector<2x1xf32>
      %cst_23 = arith.constant -5.000000e-01 : f32
      %38 = vector.broadcast %cst_23 : f32 to vector<2x1xf32>
      %39 = arith.mulf %38, %37 : vector<2x1xf32>
      %cst_24 = arith.constant dense<0.000000e+00> : vector<1xf32>
      %40 = vector.multi_reduction <add>, %39, %cst_24 [0] : vector<2x1xf32> to vector<1xf32>
      %41 = vector.shape_cast %40 : vector<1xf32> to vector<1x1xf32>
      %cst_25 = arith.constant 2.000000e+00 : f32
      %42 = vector.broadcast %cst_25 : f32 to vector<1x1xf32>
      %43 = arith.divf %41, %42 : vector<1x1xf32>
      %c0_26 = arith.constant 0 : index
      %c0_27 = arith.constant 0 : index
      %c0_28 = arith.constant 0 : index
      %44 = vector.load %arg7[%c0_26, %c0_27, %c0_28] : memref<1x1x1xf32, #tpu.memory_space<vmem>>, vector<1x1x1xf32>
      %45 = vector.shape_cast %44 : vector<1x1x1xf32> to vector<1x1xf32>
      %46 = vector.shape_cast %43 : vector<1x1xf32> to vector<1x1x1xf32>
      tpu.vector_store %arg7[%c0_26, %c0_27, %c0_28], %46 {strides = array<i32>} : memref<1x1x1xf32, #tpu.memory_space<vmem>>, vector<1x1x1xf32>,
    } else {
    }
    return
  }
  func.func @transform_0(%arg0: i32, %arg1: i32) -> (i32, i32) {
    %c1_i32 = arith.constant 1 : i32
    %0 = arith.muli %arg0, %c1_i32 : i32
    %1 = arith.addi %0, %arg1 : i32
    %c0_i32 = arith.constant 0 : i32
    %2 = arith.minsi %1, %c0_i32 : i32
    %c0_i32_0 = arith.constant 0 : i32
    %c0_i32_1 = arith.constant 0 : i32
    return %2, %c0_i32_0 : i32, i32
  }
  func.func @transform_1(%arg0: i32, %arg1: i32) -> (i32, i32) {
    %c1_i32 = arith.constant 1 : i32
    %0 = arith.muli %arg0, %c1_i32 : i32
    %1 = arith.addi %0, %arg1 : i32
    %c0_i32 = arith.constant 0 : i32
    %2 = arith.minsi %1, %c0_i32 : i32
    %c0_i32_0 = arith.constant 0 : i32
    %c0_i32_1 = arith.constant 0 : i32
    return %2, %c0_i32_0 : i32, i32
  }
  func.func @transform_2(%arg0: i32, %arg1: i32) -> (i32, i32) {
    %c0_i32 = arith.constant 0 : i32
    %c0_i32_0 = arith.constant 0 : i32
    %c0_i32_1 = arith.constant 0 : i32
    return %c0_i32, %c0_i32_0 : i32, i32
  }
  func.func @transform_3(%arg0: i32, %arg1: i32) -> (i32, i32) {
    %c0_i32 = arith.constant 0 : i32
    %c0_i32_0 = arith.constant 0 : i32
    %c0_i32_1 = arith.constant 0 : i32
    return %c0_i32, %c0_i32_0 : i32, i32
  }
  func.func @transform_4(%arg0: i32, %arg1: i32) -> (i32, i32, i32) {
    %c0_i32 = arith.constant 0 : i32
    %c0_i32_0 = arith.constant 0 : i32
    %c0_i32_1 = arith.constant 0 : i32
    return %arg0, %c0_i32, %c0_i32_0 : i32, i32, i32
  }
  func.func @transform_5(%arg0: i32, %arg1: i32) -> (i32, i32, i32) {
    %c0_i32 = arith.constant 0 : i32
    %c0_i32_0 = arith.constant 0 : i32
    %c0_i32_1 = arith.constant 0 : i32
    return %arg0, %c0_i32, %c0_i32_0 : i32, i32, i32
  }
}

</mosaic_0001>

<bundles_post_ra>
// kernel: tpu_custom_call.1
= control target key start
LH: loop header
LB: loop body
LE: loop exit
PB: predicated region body
PF: predicated region fallthrough
CT: control target
= control target key end

     0   :  { %11 = vsyncpa [#allocation4], 0  ;;  %s1060_s0 = inlined_call_operand.hbm [shape: f32[32,128], index: 0, kind: input, shape index: {}]   ;;  %s1061_s1 = inlined_call_operand.hbm [shape: f32[32,128], index: 1, kind: input, shape index: {}]   ;;  %s1062_s2 = inlined_call_operand.vmem [shape: f32[2,32], index: 2, kind: input, shape index: {}]   ;;  %s1063_s3 = inlined_call_operand.vmem [shape: f32[2,32], index: 3, kind: input, shape index: {}]   ;;  %s1064_s4 = inlined_call_operand.hbm [shape: f32[2,8,128], index: 4, kind: output, shape index: {0}]   ;;  %s1065_s5 = inlined_call_operand.vmem [shape: f32[2,1,1], index: 5, kind: output, shape index: {1}]  }
   0x1   :  { %13 = vsyncpa [#allocation4 + $0x1], 0 }
   0x2   :  { %14 = vsyncpa [#allocation7], 0 }
   0x3   :  { %16 = vsyncpa [#allocation7 + $0x1], 0 }
   0x4   :  { %17 = vsyncpa [#allocation5], 0 }
   0x5   :  { %19 = vsyncpa [#allocation5 + $0x1], 0  ;;  %s858_s18 = smov 0   ;;  %s860_s19 = smov 0  }
   0x6   :  { %s862_s20 = smov 0   ;;  %s864_s21 = smov 0  }
   0x7   :  { %s866_s22 = smov 0   ;;  %s868_s23 = smov 0  }
   0x8   :  { %s870_s24 = smov 0   ;;  %s872_s25 = smov 0  }
   0x9 LB: > { %s544_s26 = sadd.s32 4294967295, %s821_s25   ;;  %s545_s27 = sadd.s32 4294967294, %s821_s25   ;;  %s821_s25 = sphi %s872_s25, %s25_s25   ;;  %s817_s24 = sphi %s870_s24, %s1087_s24   ;;  %s813_s23 = sphi %s868_s23, %s1086_s23   ;;  %s809_s22 = sphi %s866_s22, %s1050_s22   ;;  %s805_s21 = sphi %s864_s21, %s1085_s21   ;;  %s801_s20 = sphi %s862_s20, %s1084_s20   ;;  %s797_s19 = sphi %s860_s19, %s1083_s19   ;;  %s793_s18 = sphi %s858_s18, %s1082_s18  }
   0xa   : > { %s37_s28 = sadd.s32 1, %s817_s24  ;;  %p790_p1 = scmp.ne.s32.totalorder %s809_s22, 0 }
   0xb   : > { %p39_p0 = scmp.ge.s32.totalorder %s37_s28, 2  ;;  %p58_p2 = scmp.eq.s32.totalorder %s821_s25, 0 }
   0xc   : > { %p63_p3 = scmp.ne.s32.totalorder %s809_s22, %s805_s21  ;;  %p64_p5 = scmp.eq.s32.totalorder %s544_s26, 0 }
   0xd   : > { %s1089_s28 = smov (%p39_p0, %s37_s28), 0  ;;  %p904_p4 = por %p790_p1, %p58_p2 }
   0xe   : > { %1069 = sst [smem:[#allocation12_spill]] %s1089_s28  ;;  %p908_p6 = por %p64_p5, %p63_p3 }
   0xf   : > { %s147_s6 = ssub.s32 %s817_s24, %s1089_s28  ;;  %s150_s7 = sadd.s32 1, %s801_s20 }
  0x10   : > { %s1071_s30 = scalar_select %p908_p6, 1, 0 }
  0x11   : > { %p148_p7 = scmp.eq.s32.totalorder %s147_s6, 0  ;;  %p160_p8 = scmp.ne.s32.totalorder %s801_s20, %s797_s19 }
  0x12   : > { %p161_p9 = scmp.eq.s32.totalorder %s544_s26, 1  ;;  %p166_p10 = scmp.ne.s32.totalorder %s797_s19, %s793_s18 }
  0x13   : > { %s916_s8 = scalar_select %p148_p7, %s801_s20, %s150_s7  }
  0x14   : > { %p167_p11 = scmp.eq.s32.totalorder %s545_s27, 1  ;;  %p922_p12 = por %p161_p9, %p160_p8 }
  0x15   : > { %p582_p1 = scmp.lt.s32.totalorder %s821_s25, 2  ;;  %s823_s11 = smov [#allocation3]  }
  0x16   : > { %s1072_s9 = scalar_select %p922_p12, 1, 0 }
  0x17   : > { %p927_p0 = por %p167_p11, %p166_p10  ;;  %s233_s12 = sshll.u32 %s823_s11, 4  ;;  %s234_s12 = int_to_ptr.vmem [resolvable:$true] %s233_s12 }
  0x18   : > { %p934_p2 = pnand %p582_p1, %p904_p4  ;;  %s660_s16 = scalar_lea.hbm %s1060_s0, 512 }
  0x19   : > { %s1073_s10 = scalar_select %p927_p0, 1, 0 }
  0x1a   : > { %p661_p3 = scmp.ne.s32.totalorder %s1060_s0, %s660_s16  ;;  %p662_p5 = pneg %p934_p2 }
  0x1b   : > { %p667_p8 = scmp.lt.s32.totalorder %s660_s16, %s660_s16 }
  0x1c   : > { %p663_p7 = pnand %p662_p5, %p661_p3 }
  0x1e   : > { %p664_p4 = pneg %p663_p7 }
  0x20   : > { %p669_p9 = pnand %p667_p8, %p664_p4 }
  0x22   : > { %672 = shalt.err (!%p669_p9)
}
  0x23   : > { %s673_s26 = scalar_lea.vmem %s234_s12, 512  ;;  %s680_s27 = scalar_lea.vmem %s234_s12, 1024 }
  0x24   : > { %p674_p10 = scmp.ne.s32.totalorder %s234_s12, %s673_s26  ;;  %p681_p13 = scmp.lt.s32.totalorder %s234_s12, %s234_s12 }
  0x25   : > { %p682_p0 = scmp.lt.s32.totalorder %s680_s27, %s673_s26 }
  0x26   : > { %p676_p11 = pnand %p674_p10, %p662_p5 }
  0x27   : > { %p683_p12 = por %p682_p0, %p681_p13 }
  0x28   : > { %p677_p1 = pneg %p676_p11 }
  0x2a   : > { %p684_p6 = pnand %p683_p12, %p677_p1 }
  0x2c   : > { %687 = shalt.err (!%p684_p6)
}
  0x2d   : > { %s824_s29 = smov 128   ;;  %s825_s6 = smov 8  }
  0x2e   : > { %574 = dma.hbm_to_vmem [thread:$0]  (!%p934_p2), %s1060_s0, 512, %s234_s12, [#allocation4], %s824_s29, %s824_s29, %s825_s6  }
  0x2f   : > { %p554_p3 = scmp.ge.s32.totalorder %s821_s25, 1  ;;  %p265_p7 = scmp.lt.s32.totalorder %s821_s25, 3 }
  0x30   : > { %s826_s15 = smov [#allocation6]   ;;  %s688_s26 = scalar_lea.hbm %s1061_s1, 512 }
  0x31   : > { %p959_p4 = pnand %p554_p3, %p265_p7  ;;  %s257_s16 = sshll.u32 %s826_s15, 4  ;;  %s258_s16 = int_to_ptr.vmem [resolvable:$true] %s257_s16 }
  0x32   : > { %p689_p6 = scmp.ne.s32.totalorder %s1061_s1, %s688_s26  ;;  %p695_p0 = scmp.lt.s32.totalorder %s688_s26, %s688_s26 }
  0x33   : > { %s1075_s14 = scalar_select %p959_p4, 1, 0 }
  0x34   : > { %p691_p12 = pnand %p689_p6, %p662_p5 }
  0x36   : > { %p692_p13 = pneg %p691_p12 }
  0x38   : > { %p697_p8 = pnand %p695_p0, %p692_p13 }
  0x3a   : > { %700 = shalt.err (!%p697_p8)
}
  0x3b   : > { %s701_s12 = scalar_lea.vmem %s258_s16, 512  ;;  %s708_s7 = scalar_lea.vmem %s258_s16, 1024 }
  0x3c   : > { %p702_p9 = scmp.ne.s32.totalorder %s258_s16, %s701_s12  ;;  %p709_p1 = scmp.lt.s32.totalorder %s258_s16, %s258_s16 }
  0x3d   : > { %p710_p3 = scmp.lt.s32.totalorder %s708_s7, %s701_s12 }
  0x3e   : > { %p704_p10 = pnand %p702_p9, %p662_p5 }
  0x3f   : > { %p711_p7 = por %p710_p3, %p709_p1 }
  0x40   : > { %p705_p11 = pneg %p704_p10 }
  0x42   : > { %p712_p4 = pnand %p711_p7, %p705_p11 }
  0x44   : > { %715 = shalt.err (!%p712_p4)
}
  0x45   : > { %577 = dma.hbm_to_vmem [thread:$0]  (!%p934_p2), %s1061_s1, 512, %s258_s16, [#allocation7], %s824_s29, %s824_s29, %s825_s6  }
  0x46   : > { %p1076_p6 = scmp.ne.s32.totalorder %s1075_s14, 0 }
  0x47   : > { %s271_s15 = sand.u32 (!%p1076_p6), 1, %s809_s22   ;;  %p1077_p5 = scmp.ne.s32.totalorder (!%p1076_p6), %s1071_s30, 0 }
  0x48   : > { %269 = sbr.rel (%p1076_p6) target bundleno = 256 (0x100), region = 36  ;;  %s555_s17 = sshll.u32 (!%p1076_p6), %s271_s15, 5 }
  0x49   : > { %s272_s21 = scalar_lea.sflag (!%p1076_p6), [#allocation4], %s271_s15  ;;  %s983_s26 = scalar_lea.vmem (!%p1076_p6), [#allocation3], %s555_s17 }
  0x4d   : > { %779 = dma.done.wait (%p1077_p5), %s272_s21, 512  }
  0x4e   : > { %781 = vsyncadd (%p1077_p5), %s272_s21, 4294966784  ;;  %s281_s13 = scalar_lea.sflag [#allocation7], %s271_s15  ;;  %s989_s27 = scalar_lea.vmem [#allocation6], %s555_s17 }
  0x4f   : > { %783 = dma.done.wait (%p1077_p5), %s281_s13, 512  }
  0x50   : > { %785 = vsyncadd (%p1077_p5), %s281_s13, 4294966784  ;;  %v380_v0 = vld [vmem:[%s1063_s3] sm:$0x3]  ;;  %vm387_vm0 = vcmask 254976   ;;  %v349_v9 = vlaneseq  ;;  %s558_s30 = sshll.u32 %s813_s23, 5  ;;  %v336_v12 = vld [vmem:[%s983_s26 + $0x8] sm:$0xff] }
  0x51   : > { %v384_v1 = vmul.f32 1.442695, %v380_v0  ;;  %v379_v2 = vld [vmem:[%s1062_s2] sm:$0x3]  ;;  %v381_v3 = vadd.f32 1.0, %v380_v0  ;;  %s354_s12 = ssub.s32 32, %s558_s30 }
  0x52   : > { %v382_v4 = vmul.f32 %v379_v2, %v379_v2  ;;  %v350_v10 = vshrl.u32 %v349_v9, 7  ;;  %v335_v11 = vld [vmem:[%s983_s26] sm:$0xff]  ;;  %v340_v15 = vld [vmem:[%s989_s27 + $0x8] sm:$0xff]  ;;  %v355_v17 = vstv %s354_s12  ;;  %v337_v18 = vld [vmem:[%s983_s26 + $0x10] sm:$0xff]  ;;  %s311_s7 = sand.u32 1, %s797_s19   ;;  %s560_s11 = sshll.u32 %s813_s23, 7 }
  0x53   : > { %658 = vpow2.f32 %v384_v1  ;;  %v339_v13 = vld [vmem:[%s989_s27] sm:$0xff]  ;;  %v341_v19 = vld [vmem:[%s989_s27 + $0x10] sm:$0xff]  ;;  %v344_v20 = vsub.f32 %v336_v12, %v340_v15  ;;  %v338_v24 = vld [vmem:[%s983_s26 + $0x18] sm:$0xff]  ;;  %s557_s28 = sshll.u32 %s311_s7, 3  ;;  %s419_s13 = scalar_lea.hbm %s1064_s4, %s560_s11 }
  0x54   : > { %v383_v5 = vsub.f32 %v381_v3, %v382_v4  ;;  %v351_v14 = vadd.s32 8, %v350_v10  ;;  %v343_v16 = vsub.f32 %v335_v11, %v339_v13  ;;  %v352_v21 = vadd.s32 16, %v350_v10  ;;  %v342_v25 = vld [vmem:[%s989_s27 + $0x18] sm:$0xff]  ;;  %s313_s15 = scalar_lea.vmem [#allocation8], %s557_s28  ;;  %s405_s27 = scalar_lea.sflag [#allocation5], %s311_s7 }
  0x55   : > { %vm356_vm1 = vcmp.lt.s32.totalorder %v350_v10, %v355_v17  ;;  %v345_v22 = vsub.f32 %v337_v18, %v341_v19  ;;  %v353_v26 = vadd.s32 24, %v350_v10  ;;  %v346_v29 = vsub.f32 %v338_v24, %v342_v25  ;;  %s421_s17 = sshll.u32 %s313_s15, 4  ;;  %p1078_p4 = scmp.ne.s32.totalorder %s1072_s9, 0  ;;  %s422_s17 = int_to_ptr.vmem [resolvable:$true] %s421_s17 }
  0x56   : > { %vm357_vm2 = vcmp.lt.s32.totalorder %v351_v14, %v355_v17  ;;  %v360_v23 = vsel %vm356_vm1, %v343_v16, 0.0  ;;  %vm358_vm3 = vcmp.lt.s32.totalorder %v352_v21, %v355_v17  ;;  %s716_s29 = scalar_lea.vmem %s422_s17, 128  ;;  %s827_s6 = smov [#allocation8]  }
  0x57   : > { %v361_v27 = vsel %vm357_vm2, %v344_v20, 0.0  ;;  %v365_v28 = vmul.f32 %v360_v23, %v360_v23  ;;  %v362_v30 = vsel %vm358_vm3, %v345_v22, 0.0  ;;  %vm359_vm4 = vcmp.lt.s32.totalorder %v353_v26, %v355_v17  ;;  %p717_p2 = scmp.ne.s32.totalorder %s422_s17, %s716_s29  ;;  %s720_s14 = sshll.u32 %s827_s6, 4  ;;  %s721_s14 = int_to_ptr.vmem [resolvable:$false] %s720_s14 }
  0x58   : > { %v366_v31 = vmul.f32 %v361_v27, %v361_v27  ;;  %v367_v32 = vmul.f32 %v362_v30, %v362_v30  ;;  %v363_v33 = vsel %vm359_vm4, %v346_v29, 0.0  ;;  %s722_s16 = scalar_lea.vmem %s721_s14, 256  ;;  %p723_p0 = scmp.lt.s32.totalorder %s422_s17, %s721_s14 }
  0x59   : > { %v368_v35 = vmul.f32 %v363_v33, %v363_v33  ;;  %p718_p12 = pnand %p717_p2, %p1078_p4  ;;  %p724_p8 = scmp.lt.s32.totalorder %s722_s16, %s716_s29 }
  0x5a   : > { %v369_v34 = vadd.f32 %v366_v31, %v365_v28 }
  0x5b   : > { %p719_p13 = pneg %p718_p12  ;;  %p725_p9 = por %p724_p8, %p723_p0 }
  0x5c   : > { %v370_v36 = vadd.f32 %v369_v34, %v367_v32 }
  0x5d   : > { %p726_p10 = pnand %p725_p9, %p719_p13 }
  0x5e   : > { %v371_v37 = vadd.f32 %v370_v36, %v368_v35 }
  0x60   : > { %v659_v6 = vpop.eup %658  ;;  %378 = vst [vmem:[%s313_s15] sm:$0xff] %v371_v37 }
  0x61   : > { %v386_v7 = vsub.f32 %v383_v5, %v659_v6 }
  0x63   : > { %v388_v8 = vsel %vm387_vm0, %v386_v7, 0.0 }
  0x64   : > { %389 = vadd.xlane.f32.xlu0 %v388_v8 }
  0x65   : > { %729 = shalt.err (!%p726_p10)
}
  0x66   : > { %s730_s30 = scalar_lea.hbm %s419_s13, 128  ;;  %s734_s28 = scalar_lea.hbm %s1064_s4, 256 }
  0x67   : > { %p731_p11 = scmp.ne.s32.totalorder %s419_s13, %s730_s30  ;;  %p735_p7 = scmp.lt.s32.totalorder %s419_s13, %s1064_s4 }
  0x68   : > { %p736_p6 = scmp.lt.s32.totalorder %s734_s28, %s730_s30 }
  0x69   : > { %p732_p1 = pnand %p731_p11, %p1078_p4 }
  0x6a   : > { %p737_p5 = por %p736_p6, %p735_p7 }
  0x6b   : > { %p733_p3 = pneg %p732_p1 }
  0x6d   : > { %p738_p2 = pnand %p737_p5, %p733_p3 }
  0x6f   : > { %741 = shalt.err (!%p738_p2)
}
  0x70   : > { %569 = dma.vmem_to_hbm [thread:$0]  (%p1078_p4), %s422_s17, 128, %s419_s13, %s405_s27   ;;  %vm392_vm5 = vcmask 1041408   ;;  %vm402_vm6 = vcmask 0  }
  0x71   : > { %p327_p12 = scmp.lt.s32.totalorder %s813_s23, 1 }
  0x73   : > { %s1091_s23 = smov (!%p327_p12, %s813_s23), 1 }
  0x74   : > { %s329_s29 = scalar_lea.vmem %s1065_s5, %s1091_s23 }
  0xed   : > { %v390_v38 = vpop.xlane.xlu0 %389 }
  0xee   : > { %v391_v39 = vmul.f32 -0.5, %v390_v38 }
  0xf0   : > { %v393_v40 = vsel %vm392_vm5, %v391_v39, 0.0 }
  0xf1   : > { %v394_v41 = vrot.slane %v393_v40, 4 }
  0xf3   : > { %v395_v42 = vadd.f32 %v394_v41, %v393_v40 }
  0xf5   : > { %v396_v43 = vrot.slane %v395_v42, 2 }
  0xf7   : > { %v397_v44 = vadd.f32 %v396_v43, %v395_v42 }
  0xf9   : > { %v398_v45 = vrot.slane %v397_v44, 1 }
  0xfb   : > { %v399_v46 = vadd.f32 %v398_v45, %v397_v44 }
  0xfd   : > { %v401_v47 = vmul.f32 0.5, %v399_v46 }
  0xff   : > { %403 = vst.msk [vmem:[%s329_s29] sm:$0x1] %vm402_vm6, %v401_v47 }
 0x100 PF: > { %s436_s9 = sand.u32 1, %s793_s18   ;;  %p1079_p4 = scmp.ne.s32.totalorder %s1073_s10, 0 }
 0x101   : > { %p1080_p13 = scmp.ge.s32.totalorder %s821_s25, 2  ;;  %s437_s17 = scalar_lea.sflag [#allocation5], %s436_s9 }
 0x103   : > { %p579_p0 = pnand %p1080_p13, %p1079_p4 }
 0x105   : > { %p580_p8 = pneg %p579_p0 }
 0x107   : > { %787 = dma.done.wait (%p580_p8), %s437_s17, 128  }
 0x108   : > { %789 = vsyncadd (%p580_p8), %s437_s17, 4294967168  ;;  %s25_s25 = sadd.s32 1, %s821_s25   ;;  %s1081_s13 = sld [smem:[#allocation12_spill]] }
 0x109   : > { %p22_p9 = scmp.ge.s32.totalorder %s25_s25, 4   ;;  %s1082_s18 = smov %s797_s19 }
 0x10a   : > { %s1083_s19 = smov %s801_s20  ;;  %s1084_s20 = smov %s916_s8 }
 0x10b   : > { %s1085_s21 = smov %s809_s22  ;;  %s1050_s22 = smov 0  }
 0x10c   : > { %s1086_s23 = smov %s817_s24  ;;  %24 = sbr.rel (!%p22_p9) target bundleno = 9 (0x9), region = 114 }
 0x10e   : > { %s1087_s24 = smov %s1081_s13 }
 0x111   :  { %448 = vsyncpa [#allocation4], 1 }
 0x112   :  { %450 = vsyncpa [#allocation4 + $0x1], 1 }
 0x113   :  { %451 = vsyncpa [#allocation7], 1 }
 0x114   :  { %453 = vsyncpa [#allocation7 + $0x1], 1 }
 0x115   :  { %454 = vsyncpa [#allocation5], 1 }
 0x116   :  { %456 = vsyncpa [#allocation5 + $0x1], 1 }

</bundles_post_ra>
